<compile_context>
chip_gen: v5e
topology: v5e:2x2
jax: 0.10.0
libtpu: 0.0.40
codegen_flags: <defaults>
</compile_context>

<pallas_src>
import math
import jax
import jax.numpy as jnp
from jax.experimental import pallas as pl
from jax.experimental.pallas import tpu as pltpu


def _round_up(x, m):
    return ((x + m - 1) // m) * m


def _vmem_capacity_bytes():
    try:
        return int(pltpu.get_tpu_info().vmem_capacity_bytes)
    except Exception:
        return 64 * 1024 * 1024  # conservative fallback (v7x per-TC VMEM)


# --------------------------------- kernels ----------------------------------

def ffn_kernel_resident(x_ref, w1_ref, b1_ref, w2_ref, b2_ref, o_ref):
    # Weights fully VMEM-resident; one straight-through pass per row tile.
    h = jnp.dot(x_ref[...], w1_ref[...], preferred_element_type=jnp.float32)
    h = jnp.maximum(h + b1_ref[...], 0.0)                 # bias + ReLU in f32
    out = jnp.dot(h.astype(w2_ref.dtype), w2_ref[...],
                  preferred_element_type=jnp.float32)
    o_ref[...] = (out + b2_ref[...]).astype(o_ref.dtype)


def ffn_kernel_chunked(x_ref, w1_ref, b1_ref, w2_ref, b2_ref, o_ref, acc_ref):
    # F (ff_dim) is chunked along grid axis 1 ("arbitrary"); acc_ref accumulates
    # the second matmul in f32 and is seeded with b2 at the first chunk so the
    # finalize branch is a plain cast+store.
    f = pl.program_id(1)

    @pl.when(f == 0)
    def _init():
        acc_ref[...] = jnp.broadcast_to(b2_ref[...], acc_ref.shape)

    h = jnp.dot(x_ref[...], w1_ref[...], preferred_element_type=jnp.float32)
    h = jnp.maximum(h + b1_ref[...], 0.0)                 # chunk-wise b1 is exact
    acc_ref[...] += jnp.dot(h.astype(w2_ref.dtype), w2_ref[...],
                            preferred_element_type=jnp.float32)

    @pl.when(f == pl.num_programs(1) - 1)
    def _finalize():
        o_ref[...] = acc_ref[...].astype(o_ref.dtype)


# --------------------------------- wrapper -----------------------------------

def positionwise_feedforward(x, w1, b1, w2, b2, *, tm_target=512,
                             compute_dtype=None, force_chunked=False):
    """x: (batch, seq, embed). w1: (embed, ff), b1: (ff,), w2: (ff, embed), b2: (embed,)."""
    B, S, E = x.shape
    F_dim = w1.shape[1]
    N = B * S
    out_dtype = x.dtype

    # bf16 matmuls / f32 accumulation are the MXU fast path on v6e/v7x (and fine
    # on v5e).  Exact f32 matmuls only when the caller explicitly asks.
    if compute_dtype is None:
        cdt = jnp.dtype(jnp.bfloat16) if jnp.dtype(x.dtype) == jnp.float32 \
            else jnp.dtype(x.dtype)
    else:
        cdt = jnp.dtype(compute_dtype)
    cbytes = cdt.itemsize
    obytes = jnp.dtype(out_dtype).itemsize

    # ---- VMEM budget (generation-aware) -------------------------------------
    vmem_cap = _vmem_capacity_bytes()
    vmem_limit = int(0.85 * vmem_cap)        # ~54 MiB on v7x, ~108 MiB on v5e/v6e
    plan_budget = int(0.75 * vmem_cap)       # headroom for compiler-internal scratch

    # ---- tile plan -----------------------------------------------------------
    # Lane-dense feature dims; 256-align larger dims to match the 256x256 MXU tile.
    E_pad = _round_up(E, 256 if E > 128 else 128)
    F_pad0 = _round_up(F_dim, 256 if F_dim > 128 else 128)

    # Row tile: large (amortizes any weight restreaming), 8-aligned, but split so
    # that >= 2 row tiles exist when N is big (megacore / dual-TC utilization).
    Nr = _round_up(N, 8)
    tm = min(tm_target, Nr)
    if Nr > 256 and tm >= Nr:
        tm = _round_up(pl.cdiv(Nr, 2), 8)
    N_pad = _round_up(N, tm)
    n_row = N_pad // tm

    # Resident-weight plan estimate: single-buffered weights/biases, double-
    # buffered x/out tiles, plus the (tm, F) h temporary and its cast copy.
    resident_est = (
        (E_pad * F_pad0 + F_pad0 * E_pad) * cbytes      # W1 + W2 (1 buffer each)
        + (F_pad0 + E_pad) * 4                          # b1 + b2 (f32)
        + 2 * tm * E_pad * cbytes                       # x tile (double-buffered)
        + 2 * tm * E_pad * obytes                       # out tile (double-buffered)
        + tm * F_pad0 * (4 + cbytes))                   # h (f32) + cdt cast copy
    use_resident = (not force_chunked) and resident_est <= plan_budget

    if use_resident:
        n_f, tf, F_pad = 1, F_pad0, F_pad0
    else:
        align = 256 if F_pad0 > 256 else 128

        def chunked_est(tf_):
            return (2 * (E_pad * tf_ + tf_ * E_pad) * cbytes   # W1/W2 chunks (x2 buf)
                    + 2 * tf_ * 4 + E_pad * 4                  # b1 chunk (x2) + b2
                    + 2 * tm * E_pad * cbytes                  # x tile
                    + 2 * tm * E_pad * obytes                  # out tile
                    + tm * E_pad * 4                           # f32 accumulator
                    + tm * tf_ * (4 + cbytes))                 # h + cast copy

        tf = F_pad0
        if force_chunked and F_pad0 > align:
            tf = _round_up(pl.cdiv(F_pad0, 2), align)
        while tf > align and chunked_est(tf) > plan_budget:
            tf -= align
        n_f = pl.cdiv(F_pad0, tf)
        tf = _round_up(pl.cdiv(F_pad0, n_f), align)            # rebalance chunks
        F_pad = n_f * tf
        # TODO(synk): when N is small and weights must be restreamed, Buffered(3)
        # on the W1/W2/b1 chunk specs would further hide the weight-chunk DMA.

    # ---- operand prep (pads are no-ops for aligned shapes) -------------------
    x2 = x.reshape(N, E)
    if (N_pad, E_pad) != (N, E):
        x2 = jnp.pad(x2, ((0, N_pad - N), (0, E_pad - E)))
    w1p = w1 if (E_pad, F_pad) == (E, F_dim) else jnp.pad(
        w1, ((0, E_pad - E), (0, F_pad - F_dim)))
    w2p = w2 if (F_pad, E_pad) == (F_dim, E) else jnp.pad(
        w2, ((0, F_pad - F_dim), (0, E_pad - E)))
    b1p = b1 if F_pad == F_dim else jnp.pad(b1, (0, F_pad - F_dim))
    b2p = b2 if E_pad == E else jnp.pad(b2, (0, E_pad - E))

    x2 = x2.astype(cdt)
    w1p = w1p.astype(cdt)
    w2p = w2p.astype(cdt)
    b1p = b1p.astype(jnp.float32).reshape(1, F_pad)    # biases / ReLU stay f32
    b2p = b2p.astype(jnp.float32).reshape(1, E_pad)

    # ---- pallas_call ---------------------------------------------------------
    def _pcall(single_buffer_hint):
        if single_buffer_hint:
            def cspec(shape, index_map):
                # Block index never changes -> single buffer saves VMEM (v7x).
                return pl.BlockSpec(shape, index_map, pipeline_mode=pl.Buffered(1))
        else:
            cspec = pl.BlockSpec

        if use_resident:
            grid = (n_row,)
            in_specs = [
                pl.BlockSpec((tm, E_pad), lambda i: (i, 0)),     # x rows tile
                cspec((E_pad, F_pad), lambda i: (0, 0)),         # W1 (resident)
                cspec((1, F_pad), lambda i: (0, 0)),             # b1 (resident)
                cspec((F_pad, E_pad), lambda i: (0, 0)),         # W2 (resident)
                cspec((1, E_pad), lambda i: (0, 0)),             # b2 (resident)
            ]
            out_spec = pl.BlockSpec((tm, E_pad), lambda i: (i, 0))
            kernel, scratch, dims = ffn_kernel_resident, [], ("parallel",)
        else:
            grid = (n_row, n_f)                                  # reduction axis last
            in_specs = [
                pl.BlockSpec((tm, E_pad), lambda i, f: (i, 0)),  # x rows tile
                pl.BlockSpec((E_pad, tf), lambda i, f: (0, f)),  # W1 chunk
                pl.BlockSpec((1, tf), lambda i, f: (0, f)),      # b1 chunk
                pl.BlockSpec((tf, E_pad), lambda i, f: (f, 0)),  # W2 chunk
                cspec((1, E_pad), lambda i, f: (0, 0)),          # b2 (constant)
            ]
            out_spec = pl.BlockSpec((tm, E_pad), lambda i, f: (i, 0))
            kernel = ffn_kernel_chunked
            scratch = [pltpu.VMEM((tm, E_pad), jnp.float32)]
            dims = ("parallel", "arbitrary")

        return pl.pallas_call(
            kernel,
            out_shape=jax.ShapeDtypeStruct((N_pad, E_pad), out_dtype),
            grid_spec=pltpu.PrefetchScalarGridSpec(
                num_scalar_prefetch=0,
                grid=grid,
                in_specs=in_specs,
                out_specs=out_spec,
                scratch_shapes=scratch),
            compiler_params=pltpu.CompilerParams(
                dimension_semantics=dims,
                vmem_limit_bytes=vmem_limit),
        )(x2, w1p, b1p, w2p, b2p)

    try:
        out = _pcall(True)
    except Exception:
        # pipeline_mode hint unavailable/rejected -> default double-buffering.
        out = _pcall(False)

    return out[:N, :E].reshape(B, S, E)


def init_params(key, embed_size, ff_dim, dtype=jnp.float32):
    """Deterministic init mirroring nn.Linear default (uniform +/- 1/sqrt(fan_in))."""
    k1, k2, k3, k4 = jax.random.split(key, 4)
    bound1 = 1.0 / math.sqrt(embed_size)
    bound2 = 1.0 / math.sqrt(ff_dim)
    # Stored as (in, out) == transpose of PyTorch's (out, in) weight layout.
    w1 = jax.random.uniform(k1, (embed_size, ff_dim), dtype, -bound1, bound1)
    b1 = jax.random.uniform(k2, (ff_dim,), dtype, -bound1, bound1)
    w2 = jax.random.uniform(k3, (ff_dim, embed_size), dtype, -bound2, bound2)
    b2 = jax.random.uniform(k4, (embed_size,), dtype, -bound2, bound2)
    return w1, b1, w2, b2


if __name__ == "__main__":
    key = jax.random.PRNGKey(0)
    batch, seq, embed_size, ff_dim = 2, 8, 32, 64

    kx, kp, kx2, kp2 = jax.random.split(key, 4)
    x = jax.random.normal(kx, (batch, seq, embed_size), jnp.float32)
    w1, b1, w2, b2 = init_params(kp, embed_size, ff_dim)
    ref = jnp.maximum(x @ w1 + b1, 0.0) @ w2 + b2

    # Exact f32 matmul path (matches the f32 PyTorch module), resident-weight plan.
    out_f32 = positionwise_feedforward(x, w1, b1, w2, b2, compute_dtype=jnp.float32)
    out_f32 = jax.block_until_ready(out_f32)
    assert out_f32.shape == (batch, seq, embed_size)
    assert jnp.allclose(out_f32, ref, atol=1e-4, rtol=1e-4)

    # Default fast path (bf16 matmuls, f32 accumulation) — looser tolerance.
    out_def = jax.block_until_ready(positionwise_feedforward(x, w1, b1, w2, b2))
    assert jnp.allclose(out_def, ref, atol=5e-2, rtol=5e-2)

    # Exercise the chunked (F-reduction) kernel as well, at small shapes.
    e2, f2 = 128, 512
    x2 = jax.random.normal(kx2, (batch, seq, e2), jnp.float32)
    w1b, b1b, w2b, b2b = init_params(kp2, e2, f2)
    ref2 = jnp.maximum(x2 @ w1b + b1b, 0.0) @ w2b + b2b
    out2 = positionwise_feedforward(x2, w1b, b1b, w2b, b2b,
                                    compute_dtype=jnp.float32, force_chunked=True)
    out2 = jax.block_until_ready(out2)
    assert out2.shape == (batch, seq, e2)
    assert jnp.allclose(out2, ref2, atol=5e-4, rtol=5e-4)

    print("KERNEL_OK")
</pallas_src>

<mosaic_0001>
module attributes {stable_mosaic.version = 11 : i64} {
  func.func @ffn_kernel_resident(%arg0: i32, %arg1: memref<16x128xf32, #tpu.memory_space<vmem>>, %arg2: memref<128x128xf32, #tpu.memory_space<vmem>>, %arg3: memref<1x128xf32, #tpu.memory_space<vmem>>, %arg4: memref<128x128xf32, #tpu.memory_space<vmem>>, %arg5: memref<1x128xf32, #tpu.memory_space<vmem>>, %arg6: memref<16x128xf32, #tpu.memory_space<vmem>>) attributes {dimension_semantics = [#tpu.dimension_semantics<parallel>], iteration_bounds = array<i64: 1>, scalar_prefetch = 0 : i64, scratch_operands = 0 : i64, tpu.core_type = #tpu.core_type<tc>, window_params = [{transform_indices = @transform_0, window_bounds = array<i64: 16, 128>}, {pipeline_mode = #tpu.pipeline_mode<synchronous>, transform_indices = @transform_1, window_bounds = array<i64: 128, 128>}, {pipeline_mode = #tpu.pipeline_mode<synchronous>, transform_indices = @transform_2, window_bounds = array<i64: 1, 128>}, {pipeline_mode = #tpu.pipeline_mode<synchronous>, transform_indices = @transform_3, window_bounds = array<i64: 128, 128>}, {pipeline_mode = #tpu.pipeline_mode<synchronous>, transform_indices = @transform_4, window_bounds = array<i64: 1, 128>}, {transform_indices = @transform_5, window_bounds = array<i64: 16, 128>}]} {
    %c0 = arith.constant 0 : index
    %c0_0 = arith.constant 0 : index
    %0 = vector.load %arg1[%c0, %c0_0] : memref<16x128xf32, #tpu.memory_space<vmem>>, vector<16x128xf32>
    %c0_1 = arith.constant 0 : index
    %c0_2 = arith.constant 0 : index
    %1 = vector.load %arg2[%c0_1, %c0_2] : memref<128x128xf32, #tpu.memory_space<vmem>>, vector<128x128xf32>
    %cst = arith.constant dense<0.000000e+00> : vector<16x128xf32>
    %2 = tpu.matmul %0, %1, %cst {dimension_numbers = #tpu.dot_dimension_numbers<[1], [0], [0], [1], [0, 0, 1, 1], [], []>} : vector<16x128xf32>, vector<128x128xf32>, vector<16x128xf32> -> vector<16x128xf32>
    %c0_3 = arith.constant 0 : index
    %c0_4 = arith.constant 0 : index
    %3 = vector.load %arg3[%c0_3, %c0_4] : memref<1x128xf32, #tpu.memory_space<vmem>>, vector<1x128xf32>
    %4 = vector.broadcast %3 : vector<1x128xf32> to vector<16x128xf32>
    %5 = arith.addf %2, %4 : vector<16x128xf32>
    %cst_5 = arith.constant 0.000000e+00 : f32
    %6 = vector.broadcast %cst_5 : f32 to vector<16x128xf32>
    %7 = arith.maximumf %5, %6 : vector<16x128xf32>
    %c0_6 = arith.constant 0 : index
    %c0_7 = arith.constant 0 : index
    %8 = vector.load %arg4[%c0_6, %c0_7] : memref<128x128xf32, #tpu.memory_space<vmem>>, vector<128x128xf32>
    %cst_8 = arith.constant dense<0.000000e+00> : vector<16x128xf32>
    %9 = tpu.matmul %7, %8, %cst_8 {dimension_numbers = #tpu.dot_dimension_numbers<[1], [0], [0], [1], [0, 0, 1, 1], [], []>} : vector<16x128xf32>, vector<128x128xf32>, vector<16x128xf32> -> vector<16x128xf32>
    %c0_9 = arith.constant 0 : index
    %c0_10 = arith.constant 0 : index
    %10 = vector.load %arg5[%c0_9, %c0_10] : memref<1x128xf32, #tpu.memory_space<vmem>>, vector<1x128xf32>
    %11 = vector.broadcast %10 : vector<1x128xf32> to vector<16x128xf32>
    %12 = arith.addf %9, %11 : vector<16x128xf32>
    %c0_11 = arith.constant 0 : index
    %c0_12 = arith.constant 0 : index
    %13 = vector.load %arg6[%c0_11, %c0_12] : memref<16x128xf32, #tpu.memory_space<vmem>>, vector<16x128xf32>
    tpu.vector_store %arg6[%c0_11, %c0_12], %12 {strides = array<i32>} : memref<16x128xf32, #tpu.memory_space<vmem>>, vector<16x128xf32>,
    return
  }
  func.func @transform_0(%arg0: i32) -> (i32, i32) {
    %c0_i32 = arith.constant 0 : i32
    %c0_i32_0 = arith.constant 0 : i32
    return %arg0, %c0_i32 : i32, i32
  }
  func.func @transform_1(%arg0: i32) -> (i32, i32) {
    %c0_i32 = arith.constant 0 : i32
    %c0_i32_0 = arith.constant 0 : i32
    %c0_i32_1 = arith.constant 0 : i32
    return %c0_i32, %c0_i32_0 : i32, i32
  }
  func.func @transform_2(%arg0: i32) -> (i32, i32) {
    %c0_i32 = arith.constant 0 : i32
    %c0_i32_0 = arith.constant 0 : i32
    %c0_i32_1 = arith.constant 0 : i32
    return %c0_i32, %c0_i32_0 : i32, i32
  }
  func.func @transform_3(%arg0: i32) -> (i32, i32) {
    %c0_i32 = arith.constant 0 : i32
    %c0_i32_0 = arith.constant 0 : i32
    %c0_i32_1 = arith.constant 0 : i32
    return %c0_i32, %c0_i32_0 : i32, i32
  }
  func.func @transform_4(%arg0: i32) -> (i32, i32) {
    %c0_i32 = arith.constant 0 : i32
    %c0_i32_0 = arith.constant 0 : i32
    %c0_i32_1 = arith.constant 0 : i32
    return %c0_i32, %c0_i32_0 : i32, i32
  }
  func.func @transform_5(%arg0: i32) -> (i32, i32) {
    %c0_i32 = arith.constant 0 : i32
    %c0_i32_0 = arith.constant 0 : i32
    return %arg0, %c0_i32 : i32, i32
  }
}

module attributes {stable_mosaic.version = 11 : i64} {
  func.func @ffn_kernel_resident(%arg0: i32, %arg1: memref<16x128xf32, #tpu.memory_space<vmem>>, %arg2: memref<128x128xf32, #tpu.memory_space<vmem>>, %arg3: memref<1x128xf32, #tpu.memory_space<vmem>>, %arg4: memref<128x128xf32, #tpu.memory_space<vmem>>, %arg5: memref<1x128xf32, #tpu.memory_space<vmem>>, %arg6: memref<16x128xf32, #tpu.memory_space<vmem>>) attributes {dimension_semantics = [#tpu.dimension_semantics<parallel>], iteration_bounds = array<i64: 1>, scalar_prefetch = 0 : i64, scratch_operands = 0 : i64, tpu.core_type = #tpu.core_type<tc>, window_params = [{transform_indices = @transform_0, window_bounds = array<i64: 16, 128>}, {pipeline_mode = #tpu.pipeline_mode<synchronous>, transform_indices = @transform_1, window_bounds = array<i64: 128, 128>}, {pipeline_mode = #tpu.pipeline_mode<synchronous>, transform_indices = @transform_2, window_bounds = array<i64: 1, 128>}, {pipeline_mode = #tpu.pipeline_mode<synchronous>, transform_indices = @transform_3, window_bounds = array<i64: 128, 128>}, {pipeline_mode = #tpu.pipeline_mode<synchronous>, transform_indices = @transform_4, window_bounds = array<i64: 1, 128>}, {transform_indices = @transform_5, window_bounds = array<i64: 16, 128>}]} {
    %c0 = arith.constant 0 : index
    %c0_0 = arith.constant 0 : index
    %0 = vector.load %arg1[%c0, %c0_0] : memref<16x128xf32, #tpu.memory_space<vmem>>, vector<16x128xf32>
    %c0_1 = arith.constant 0 : index
    %c0_2 = arith.constant 0 : index
    %1 = vector.load %arg2[%c0_1, %c0_2] : memref<128x128xf32, #tpu.memory_space<vmem>>, vector<128x128xf32>
    %cst = arith.constant dense<0.000000e+00> : vector<16x128xf32>
    %2 = tpu.matmul %0, %1, %cst {dimension_numbers = #tpu.dot_dimension_numbers<[1], [0], [0], [1], [0, 0, 1, 1], [], []>} : vector<16x128xf32>, vector<128x128xf32>, vector<16x128xf32> -> vector<16x128xf32>
    %c0_3 = arith.constant 0 : index
    %c0_4 = arith.constant 0 : index
    %3 = vector.load %arg3[%c0_3, %c0_4] : memref<1x128xf32, #tpu.memory_space<vmem>>, vector<1x128xf32>
    %4 = vector.broadcast %3 : vector<1x128xf32> to vector<16x128xf32>
    %5 = arith.addf %2, %4 : vector<16x128xf32>
    %cst_5 = arith.constant 0.000000e+00 : f32
    %6 = vector.broadcast %cst_5 : f32 to vector<16x128xf32>
    %7 = arith.maximumf %5, %6 : vector<16x128xf32>
    %c0_6 = arith.constant 0 : index
    %c0_7 = arith.constant 0 : index
    %8 = vector.load %arg4[%c0_6, %c0_7] : memref<128x128xf32, #tpu.memory_space<vmem>>, vector<128x128xf32>
    %cst_8 = arith.constant dense<0.000000e+00> : vector<16x128xf32>
    %9 = tpu.matmul %7, %8, %cst_8 {dimension_numbers = #tpu.dot_dimension_numbers<[1], [0], [0], [1], [0, 0, 1, 1], [], []>} : vector<16x128xf32>, vector<128x128xf32>, vector<16x128xf32> -> vector<16x128xf32>
    %c0_9 = arith.constant 0 : index
    %c0_10 = arith.constant 0 : index
    %10 = vector.load %arg5[%c0_9, %c0_10] : memref<1x128xf32, #tpu.memory_space<vmem>>, vector<1x128xf32>
    %11 = vector.broadcast %10 : vector<1x128xf32> to vector<16x128xf32>
    %12 = arith.addf %9, %11 : vector<16x128xf32>
    %c0_11 = arith.constant 0 : index
    %c0_12 = arith.constant 0 : index
    %13 = vector.load %arg6[%c0_11, %c0_12] : memref<16x128xf32, #tpu.memory_space<vmem>>, vector<16x128xf32>
    tpu.vector_store %arg6[%c0_11, %c0_12], %12 {strides = array<i32>} : memref<16x128xf32, #tpu.memory_space<vmem>>, vector<16x128xf32>,
    return
  }
  func.func @transform_0(%arg0: i32) -> (i32, i32) {
    %c0_i32 = arith.constant 0 : i32
    %c0_i32_0 = arith.constant 0 : i32
    return %arg0, %c0_i32 : i32, i32
  }
  func.func @transform_1(%arg0: i32) -> (i32, i32) {
    %c0_i32 = arith.constant 0 : i32
    %c0_i32_0 = arith.constant 0 : i32
    %c0_i32_1 = arith.constant 0 : i32
    return %c0_i32, %c0_i32_0 : i32, i32
  }
  func.func @transform_2(%arg0: i32) -> (i32, i32) {
    %c0_i32 = arith.constant 0 : i32
    %c0_i32_0 = arith.constant 0 : i32
    %c0_i32_1 = arith.constant 0 : i32
    return %c0_i32, %c0_i32_0 : i32, i32
  }
  func.func @transform_3(%arg0: i32) -> (i32, i32) {
    %c0_i32 = arith.constant 0 : i32
    %c0_i32_0 = arith.constant 0 : i32
    %c0_i32_1 = arith.constant 0 : i32
    return %c0_i32, %c0_i32_0 : i32, i32
  }
  func.func @transform_4(%arg0: i32) -> (i32, i32) {
    %c0_i32 = arith.constant 0 : i32
    %c0_i32_0 = arith.constant 0 : i32
    %c0_i32_1 = arith.constant 0 : i32
    return %c0_i32, %c0_i32_0 : i32, i32
  }
  func.func @transform_5(%arg0: i32) -> (i32, i32) {
    %c0_i32 = arith.constant 0 : i32
    %c0_i32_0 = arith.constant 0 : i32
    return %arg0, %c0_i32 : i32, i32
  }
}

</mosaic_0001>

<bundles_post_ra>
// kernel: tpu_custom_call.1
= control target key start
LH: loop header
LB: loop body
LE: loop exit
PB: predicated region body
PF: predicated region fallthrough
CT: control target
= control target key end

     0   :  { %10 = vsyncpa [#allocation3], 0  ;;  %s388_s0 = inlined_call_operand.hbm [shape: f32[16,128], index: 0, kind: input, shape index: {}]   ;;  %s389_s1 = inlined_call_operand.hbm [shape: f32[128,128], index: 1, kind: input, shape index: {}]   ;;  %s390_s2 = inlined_call_operand.vmem [shape: f32[1,128], index: 2, kind: input, shape index: {}]   ;;  %s391_s3 = inlined_call_operand.hbm [shape: f32[128,128], index: 3, kind: input, shape index: {}]   ;;  %s392_s4 = inlined_call_operand.vmem [shape: f32[1,128], index: 4, kind: input, shape index: {}]   ;;  %s393_s5 = inlined_call_operand.hbm [shape: f32[16,128], index: 5, kind: output, shape index: {}]  }
   0x1   :  { %11 = vsyncpa [#allocation6], 0 }
   0x2   :  { %12 = vsyncpa [#allocation4], 0  ;;  %s30_s20 = sshll.u32 %s389_s1, 4  ;;  %s322_s21 = smov [#allocation5]   ;;  %s31_s20 = int_to_ptr.hbm [resolvable:$true] %s30_s20 }
   0x3   :  { %s32_s22 = sshll.u32 %s322_s21, 4  ;;  %s17_s25 = sshll.u32 %s388_s0, 4  ;;  %s33_s22 = int_to_ptr.vmem [resolvable:$true] %s32_s22  ;;  %s18_s25 = int_to_ptr.hbm [resolvable:$true] %s17_s25 }
   0x4   :  { %s323_s26 = smov 128   ;;  %s324_s27 = smov 8  }
   0x5   :  { %38 = dma.hbm_to_vmem [thread:$0]  %s31_s20, 2048, %s33_s22, [#allocation6], %s323_s26, %s323_s26, %s324_s27  }
   0x6   :  { %s325_s28 = smov [#allocation2]   ;;  %s45_s1 = sshll.u32 %s391_s3, 4  ;;  %s46_s1 = int_to_ptr.hbm [resolvable:$true] %s45_s1 }
   0x7   :  { %s19_s29 = sshll.u32 %s325_s28, 4  ;;  %s326_s0 = smov [#allocation7]   ;;  %s20_s29 = int_to_ptr.vmem [resolvable:$true] %s19_s29 }
   0x8   :  { %25 = dma.hbm_to_vmem [thread:$0]  %s18_s25, 256, %s20_s29, [#allocation3], %s323_s26, %s323_s26, %s324_s27  }
   0x9   :  { %s47_s7 = sshll.u32 %s326_s0, 4  ;;  %s48_s7 = int_to_ptr.vmem [resolvable:$true] %s47_s7 }
   0xa   :  { %53 = dma.hbm_to_vmem [thread:$0]  %s46_s1, 2048, %s48_s7, [#allocation6], %s323_s26, %s323_s26, %s324_s27  }
   0xb   :  { %316 = dma.done.wait [#allocation3], 256  }
   0xc   :  { %317 = vsyncadd [#allocation3], 4294967040 }
   0xd   :  { %318 = dma.done.wait [#allocation6], 4096  }
   0xe   :  { %319 = vsyncadd [#allocation6], 4294963200  ;;  %v85_v0 = vld [vmem:[#allocation5 + $0x78] sm:$0xff]  ;;  %v84_v1 = vld [vmem:[#allocation5 + $0x70] sm:$0xff]  ;;  %s327_s11 = smov [#allocation8]  }
   0xf   :  { %180 = vmatpush.msra.mxu2 %v85_v0  ;;  %90 = vmatpush.msra.mxu0 %v85_v0  ;;  %v83_v2 = vld [vmem:[#allocation5 + $0x68] sm:$0xff]  ;;  %v82_v3 = vld [vmem:[#allocation5 + $0x60] sm:$0xff]  ;;  %v81_v4 = vld [vmem:[#allocation5 + $0x58] sm:$0xff]  ;;  %s164_s12 = sshll.u32 %s327_s11, 4  ;;  %s165_s12 = int_to_ptr.vmem [resolvable:$true] %s164_s12 }
  0x10   :  { %v130_v5 = vld [vmem:[#allocation7 + $0x78] sm:$0xff]  ;;  %v129_v6 = vld [vmem:[#allocation7 + $0x70] sm:$0xff]  ;;  %v128_v8 = vld [vmem:[#allocation7 + $0x68] sm:$0xff] }
  0x11   :  { %181 = vmatpush.msra.mxu2 %v84_v1  ;;  %91 = vmatpush.msra.mxu0 %v84_v1  ;;  %v80_v7 = vld [vmem:[#allocation5 + $0x50] sm:$0xff]  ;;  %v79_v9 = vld [vmem:[#allocation5 + $0x48] sm:$0xff]  ;;  %v127_v10 = vld [vmem:[#allocation7 + $0x60] sm:$0xff] }
  0x12   :  { %196 = vmatpush.msra.mxu3 %v130_v5  ;;  %135 = vmatpush.msra.mxu1 %v130_v5  ;;  %v78_v11 = vld [vmem:[#allocation5 + $0x40] sm:$0xff]  ;;  %v126_v12 = vld [vmem:[#allocation7 + $0x58] sm:$0xff]  ;;  %v125_v14 = vld [vmem:[#allocation7 + $0x50] sm:$0xff] }
  0x13   :  { %182 = vmatpush.msra.mxu2 %v83_v2  ;;  %92 = vmatpush.msra.mxu0 %v83_v2  ;;  %v77_v13 = vld [vmem:[#allocation5 + $0x38] sm:$0xff]  ;;  %v76_v15 = vld [vmem:[#allocation5 + $0x30] sm:$0xff]  ;;  %v124_v16 = vld [vmem:[#allocation7 + $0x48] sm:$0xff] }
  0x14   :  { %197 = vmatpush.msra.mxu3 %v129_v6  ;;  %136 = vmatpush.msra.mxu1 %v129_v6  ;;  %v75_v17 = vld [vmem:[#allocation5 + $0x28] sm:$0xff]  ;;  %v123_v18 = vld [vmem:[#allocation7 + $0x40] sm:$0xff]  ;;  %v122_v20 = vld [vmem:[#allocation7 + $0x38] sm:$0xff] }
  0x15   :  { %183 = vmatpush.msra.mxu2 %v82_v3  ;;  %93 = vmatpush.msra.mxu0 %v82_v3  ;;  %v74_v19 = vld [vmem:[#allocation5 + $0x20] sm:$0xff]  ;;  %v73_v21 = vld [vmem:[#allocation5 + $0x18] sm:$0xff]  ;;  %v121_v22 = vld [vmem:[#allocation7 + $0x30] sm:$0xff] }
  0x16   :  { %198 = vmatpush.msra.mxu3 %v128_v8  ;;  %137 = vmatpush.msra.mxu1 %v128_v8  ;;  %v72_v23 = vld [vmem:[#allocation5 + $0x10] sm:$0xff]  ;;  %v120_v24 = vld [vmem:[#allocation7 + $0x28] sm:$0xff]  ;;  %v119_v26 = vld [vmem:[#allocation7 + $0x20] sm:$0xff] }
  0x17   :  { %184 = vmatpush.msra.mxu2 %v81_v4  ;;  %94 = vmatpush.msra.mxu0 %v81_v4  ;;  %v71_v25 = vld [vmem:[#allocation5 + $0x8] sm:$0xff]  ;;  %v70_v27 = vld [vmem:[#allocation5] sm:$0xff]  ;;  %v69_v28 = vld [vmem:[#allocation2 + $0x8] sm:$0xff] }
  0x18   :  { %199 = vmatpush.msra.mxu3 %v127_v10  ;;  %138 = vmatpush.msra.mxu1 %v127_v10  ;;  %v68_v29 = vld [vmem:[#allocation2] sm:$0xff]  ;;  %v118_v30 = vld [vmem:[#allocation7 + $0x18] sm:$0xff]  ;;  %v116_v32 = vld [vmem:[#allocation7 + $0x8] sm:$0xff] }
  0x19   :  { %185 = vmatpush.msra.mxu2 %v80_v7  ;;  %95 = vmatpush.msra.mxu0 %v80_v7  ;;  %v117_v31 = vld [vmem:[#allocation7 + $0x10] sm:$0xff]  ;;  %v115_v33 = vld [vmem:[#allocation7] sm:$0xff] }
  0x1a   :  { %200 = vmatpush.msra.mxu3 %v126_v12  ;;  %139 = vmatpush.msra.mxu1 %v126_v12  ;;  %v218_v34 = vld [vmem:[%s390_s2] ss:$0 sm:$0xff]  ;;  %s166_s2 = sshll.u32 %s393_s5, 4  ;;  %s167_s2 = int_to_ptr.hbm [resolvable:$true] %s166_s2 }
  0x1b   :  { %186 = vmatpush.msra.mxu2 %v79_v9  ;;  %96 = vmatpush.msra.mxu0 %v79_v9  ;;  %v219_v41 = vld [vmem:[%s392_s4] ss:$0 sm:$0xff] }
  0x1c   :  { %201 = vmatpush.msra.mxu3 %v125_v14  ;;  %140 = vmatpush.msra.mxu1 %v125_v14 }
  0x1d   :  { %187 = vmatpush.msra.mxu2 %v78_v11  ;;  %97 = vmatpush.msra.mxu0 %v78_v11 }
  0x1e   :  { %202 = vmatpush.msra.mxu3 %v124_v16  ;;  %141 = vmatpush.msra.mxu1 %v124_v16 }
  0x1f   :  { %188 = vmatpush.msra.mxu2 %v77_v13  ;;  %98 = vmatpush.msra.mxu0 %v77_v13 }
  0x20   :  { %203 = vmatpush.msra.mxu3 %v123_v18  ;;  %142 = vmatpush.msra.mxu1 %v123_v18 }
  0x21   :  { %189 = vmatpush.msra.mxu2 %v76_v15  ;;  %99 = vmatpush.msra.mxu0 %v76_v15 }
  0x22   :  { %204 = vmatpush.msra.mxu3 %v122_v20  ;;  %143 = vmatpush.msra.mxu1 %v122_v20 }
  0x23   :  { %190 = vmatpush.msra.mxu2 %v75_v17  ;;  %100 = vmatpush.msra.mxu0 %v75_v17 }
  0x24   :  { %205 = vmatpush.msra.mxu3 %v121_v22  ;;  %144 = vmatpush.msra.mxu1 %v121_v22 }
  0x25   :  { %191 = vmatpush.msra.mxu2 %v74_v19  ;;  %101 = vmatpush.msra.mxu0 %v74_v19 }
  0x26   :  { %206 = vmatpush.msra.mxu3 %v120_v24  ;;  %145 = vmatpush.msra.mxu1 %v120_v24 }
  0x27   :  { %192 = vmatpush.msra.mxu2 %v73_v21  ;;  %102 = vmatpush.msra.mxu0 %v73_v21 }
  0x28   :  { %207 = vmatpush.msra.mxu3 %v119_v26  ;;  %146 = vmatpush.msra.mxu1 %v119_v26 }
  0x29   :  { %193 = vmatpush.msra.mxu2 %v72_v23  ;;  %103 = vmatpush.msra.mxu0 %v72_v23 }
  0x2a   :  { %208 = vmatpush.msra.mxu3 %v118_v30  ;;  %147 = vmatpush.msra.mxu1 %v118_v30 }
  0x2b   :  { %194 = vmatpush.msra.mxu2 %v71_v25  ;;  %104 = vmatpush.msra.mxu0 %v71_v25 }
  0x2c   :  { %209 = vmatpush.msra.mxu3 %v117_v31  ;;  %148 = vmatpush.msra.mxu1 %v117_v31 }
  0x2d   :  { %195 = vmatpush.msra.mxu2 %v70_v27  ;;  %105 = vmatpush.msra.mxu0 %v70_v27 }
  0x2e   :  { %109 = vmatmul.f32.vlgmr.msra.gmra.mxu2 %v69_v28  ;;  %106 = vmatmul.f32.vlgmr.msra.gmra.mxu0 %v68_v29 }
  0x2f   :  { %210 = vmatpush.msra.mxu3 %v116_v32  ;;  %149 = vmatpush.msra.mxu1 %v116_v32 }
  0x31   :  { %211 = vmatpush.msra.mxu3 %v115_v33  ;;  %150 = vmatpush.msra.mxu1 %v115_v33 }
  0xab   :  { %v107_v35 = vpop.f32.mrf.mxu0 }
  0xac   :  { %v108_v36 = vadd.f32 %v218_v34, %v107_v35 }
  0xae   :  { %v113_v37 = vmax.f32 %v108_v36, 0.0 }
  0xb0   :  { %151 = vmatmul.f32.vlgmr.msra.gmra.mxu1 %v113_v37 }
  0xb1   :  { %v110_v38 = vpop.f32.mrf.mxu2 }
  0xb2   :  { %v111_v39 = vadd.f32 %v218_v34, %v110_v38 }
  0xb4   :  { %v114_v40 = vmax.f32 %v111_v39, 0.0 }
  0xb6   :  { %154 = vmatmul.f32.vlgmr.msra.gmra.mxu3 %v114_v40 }
 0x12d   :  { %v152_v42 = vpop.f32.mrf.mxu1 }
 0x12e   :  { %v153_v43 = vadd.f32 %v219_v41, %v152_v42 }
 0x130   :  { %158 = vst [vmem:[#allocation8] sm:$0xff] %v153_v43 }
 0x139   :  { %v155_v44 = vpop.f32.mrf.mxu3 }
 0x13a   :  { %v156_v45 = vadd.f32 %v219_v41, %v155_v44 }
 0x13c   :  { %159 = vst [vmem:[#allocation8 + $0x8] sm:$0xff] %v156_v45 }
 0x13d   :  { %172 = dma.vmem_to_hbm [thread:$0]  %s165_s12, 256, %s167_s2, [#allocation4], %s323_s26, %s323_s26, %s324_s27  }
 0x13e   :  { %320 = dma.done.wait [#allocation4], 256  }
 0x13f   :  { %321 = vsyncadd [#allocation4], 4294967040 }
 0x140   :  { %177 = vsyncpa [#allocation3], 1 }
 0x141   :  { %178 = vsyncpa [#allocation6], 1 }
 0x142   :  { %179 = vsyncpa [#allocation4], 1 }

// kernel: tpu_custom_call.1
= control target key start
LH: loop header
LB: loop body
LE: loop exit
PB: predicated region body
PF: predicated region fallthrough
CT: control target
= control target key end

     0   :  { %10 = vsyncpa [#allocation3], 0  ;;  %s388_s0 = inlined_call_operand.hbm [shape: f32[16,128], index: 0, kind: input, shape index: {}]   ;;  %s389_s1 = inlined_call_operand.hbm [shape: f32[128,128], index: 1, kind: input, shape index: {}]   ;;  %s390_s2 = inlined_call_operand.vmem [shape: f32[1,128], index: 2, kind: input, shape index: {}]   ;;  %s391_s3 = inlined_call_operand.hbm [shape: f32[128,128], index: 3, kind: input, shape index: {}]   ;;  %s392_s4 = inlined_call_operand.vmem [shape: f32[1,128], index: 4, kind: input, shape index: {}]   ;;  %s393_s5 = inlined_call_operand.hbm [shape: f32[16,128], index: 5, kind: output, shape index: {}]  }
   0x1   :  { %11 = vsyncpa [#allocation6], 0 }
   0x2   :  { %12 = vsyncpa [#allocation4], 0  ;;  %s30_s20 = sshll.u32 %s389_s1, 4  ;;  %s322_s21 = smov [#allocation5]   ;;  %s31_s20 = int_to_ptr.hbm [resolvable:$true] %s30_s20 }
   0x3   :  { %s32_s22 = sshll.u32 %s322_s21, 4  ;;  %s17_s25 = sshll.u32 %s388_s0, 4  ;;  %s33_s22 = int_to_ptr.vmem [resolvable:$true] %s32_s22  ;;  %s18_s25 = int_to_ptr.hbm [resolvable:$true] %s17_s25 }
   0x4   :  { %s323_s26 = smov 128   ;;  %s324_s27 = smov 8  }
   0x5   :  { %38 = dma.hbm_to_vmem [thread:$0]  %s31_s20, 2048, %s33_s22, [#allocation6], %s323_s26, %s323_s26, %s324_s27  }
   0x6   :  { %s325_s28 = smov [#allocation2]   ;;  %s45_s1 = sshll.u32 %s391_s3, 4  ;;  %s46_s1 = int_to_ptr.hbm [resolvable:$true] %s45_s1 }
   0x7   :  { %s19_s29 = sshll.u32 %s325_s28, 4  ;;  %s326_s0 = smov [#allocation7]   ;;  %s20_s29 = int_to_ptr.vmem [resolvable:$true] %s19_s29 }
   0x8   :  { %25 = dma.hbm_to_vmem [thread:$0]  %s18_s25, 256, %s20_s29, [#allocation3], %s323_s26, %s323_s26, %s324_s27  }
   0x9   :  { %s47_s7 = sshll.u32 %s326_s0, 4  ;;  %s48_s7 = int_to_ptr.vmem [resolvable:$true] %s47_s7 }
   0xa   :  { %53 = dma.hbm_to_vmem [thread:$0]  %s46_s1, 2048, %s48_s7, [#allocation6], %s323_s26, %s323_s26, %s324_s27  }
   0xb   :  { %316 = dma.done.wait [#allocation3], 256  }
   0xc   :  { %317 = vsyncadd [#allocation3], 4294967040 }
   0xd   :  { %318 = dma.done.wait [#allocation6], 4096  }
   0xe   :  { %319 = vsyncadd [#allocation6], 4294963200  ;;  %v85_v0 = vld [vmem:[#allocation5 + $0x78] sm:$0xff]  ;;  %v84_v1 = vld [vmem:[#allocation5 + $0x70] sm:$0xff]  ;;  %s327_s11 = smov [#allocation8]  }
   0xf   :  { %180 = vmatpush.msra.mxu2 %v85_v0  ;;  %90 = vmatpush.msra.mxu0 %v85_v0  ;;  %v83_v2 = vld [vmem:[#allocation5 + $0x68] sm:$0xff]  ;;  %v82_v3 = vld [vmem:[#allocation5 + $0x60] sm:$0xff]  ;;  %v81_v4 = vld [vmem:[#allocation5 + $0x58] sm:$0xff]  ;;  %s164_s12 = sshll.u32 %s327_s11, 4  ;;  %s165_s12 = int_to_ptr.vmem [resolvable:$true] %s164_s12 }
  0x10   :  { %v130_v5 = vld [vmem:[#allocation7 + $0x78] sm:$0xff]  ;;  %v129_v6 = vld [vmem:[#allocation7 + $0x70] sm:$0xff]  ;;  %v128_v8 = vld [vmem:[#allocation7 + $0x68] sm:$0xff] }
  0x11   :  { %181 = vmatpush.msra.mxu2 %v84_v1  ;;  %91 = vmatpush.msra.mxu0 %v84_v1  ;;  %v80_v7 = vld [vmem:[#allocation5 + $0x50] sm:$0xff]  ;;  %v79_v9 = vld [vmem:[#allocation5 + $0x48] sm:$0xff]  ;;  %v127_v10 = vld [vmem:[#allocation7 + $0x60] sm:$0xff] }
  0x12   :  { %196 = vmatpush.msra.mxu3 %v130_v5  ;;  %135 = vmatpush.msra.mxu1 %v130_v5  ;;  %v78_v11 = vld [vmem:[#allocation5 + $0x40] sm:$0xff]  ;;  %v126_v12 = vld [vmem:[#allocation7 + $0x58] sm:$0xff]  ;;  %v125_v14 = vld [vmem:[#allocation7 + $0x50] sm:$0xff] }
  0x13   :  { %182 = vmatpush.msra.mxu2 %v83_v2  ;;  %92 = vmatpush.msra.mxu0 %v83_v2  ;;  %v77_v13 = vld [vmem:[#allocation5 + $0x38] sm:$0xff]  ;;  %v76_v15 = vld [vmem:[#allocation5 + $0x30] sm:$0xff]  ;;  %v124_v16 = vld [vmem:[#allocation7 + $0x48] sm:$0xff] }
  0x14   :  { %197 = vmatpush.msra.mxu3 %v129_v6  ;;  %136 = vmatpush.msra.mxu1 %v129_v6  ;;  %v75_v17 = vld [vmem:[#allocation5 + $0x28] sm:$0xff]  ;;  %v123_v18 = vld [vmem:[#allocation7 + $0x40] sm:$0xff]  ;;  %v122_v20 = vld [vmem:[#allocation7 + $0x38] sm:$0xff] }
  0x15   :  { %183 = vmatpush.msra.mxu2 %v82_v3  ;;  %93 = vmatpush.msra.mxu0 %v82_v3  ;;  %v74_v19 = vld [vmem:[#allocation5 + $0x20] sm:$0xff]  ;;  %v73_v21 = vld [vmem:[#allocation5 + $0x18] sm:$0xff]  ;;  %v121_v22 = vld [vmem:[#allocation7 + $0x30] sm:$0xff] }
  0x16   :  { %198 = vmatpush.msra.mxu3 %v128_v8  ;;  %137 = vmatpush.msra.mxu1 %v128_v8  ;;  %v72_v23 = vld [vmem:[#allocation5 + $0x10] sm:$0xff]  ;;  %v120_v24 = vld [vmem:[#allocation7 + $0x28] sm:$0xff]  ;;  %v119_v26 = vld [vmem:[#allocation7 + $0x20] sm:$0xff] }
  0x17   :  { %184 = vmatpush.msra.mxu2 %v81_v4  ;;  %94 = vmatpush.msra.mxu0 %v81_v4  ;;  %v71_v25 = vld [vmem:[#allocation5 + $0x8] sm:$0xff]  ;;  %v70_v27 = vld [vmem:[#allocation5] sm:$0xff]  ;;  %v69_v28 = vld [vmem:[#allocation2 + $0x8] sm:$0xff] }
  0x18   :  { %199 = vmatpush.msra.mxu3 %v127_v10  ;;  %138 = vmatpush.msra.mxu1 %v127_v10  ;;  %v68_v29 = vld [vmem:[#allocation2] sm:$0xff]  ;;  %v118_v30 = vld [vmem:[#allocation7 + $0x18] sm:$0xff]  ;;  %v116_v32 = vld [vmem:[#allocation7 + $0x8] sm:$0xff] }
  0x19   :  { %185 = vmatpush.msra.mxu2 %v80_v7  ;;  %95 = vmatpush.msra.mxu0 %v80_v7  ;;  %v117_v31 = vld [vmem:[#allocation7 + $0x10] sm:$0xff]  ;;  %v115_v33 = vld [vmem:[#allocation7] sm:$0xff] }
  0x1a   :  { %200 = vmatpush.msra.mxu3 %v126_v12  ;;  %139 = vmatpush.msra.mxu1 %v126_v12  ;;  %v218_v34 = vld [vmem:[%s390_s2] ss:$0 sm:$0xff]  ;;  %s166_s2 = sshll.u32 %s393_s5, 4  ;;  %s167_s2 = int_to_ptr.hbm [resolvable:$true] %s166_s2 }
  0x1b   :  { %186 = vmatpush.msra.mxu2 %v79_v9  ;;  %96 = vmatpush.msra.mxu0 %v79_v9  ;;  %v219_v41 = vld [vmem:[%s392_s4] ss:$0 sm:$0xff] }
  0x1c   :  { %201 = vmatpush.msra.mxu3 %v125_v14  ;;  %140 = vmatpush.msra.mxu1 %v125_v14 }
  0x1d   :  { %187 = vmatpush.msra.mxu2 %v78_v11  ;;  %97 = vmatpush.msra.mxu0 %v78_v11 }
  0x1e   :  { %202 = vmatpush.msra.mxu3 %v124_v16  ;;  %141 = vmatpush.msra.mxu1 %v124_v16 }
  0x1f   :  { %188 = vmatpush.msra.mxu2 %v77_v13  ;;  %98 = vmatpush.msra.mxu0 %v77_v13 }
  0x20   :  { %203 = vmatpush.msra.mxu3 %v123_v18  ;;  %142 = vmatpush.msra.mxu1 %v123_v18 }
  0x21   :  { %189 = vmatpush.msra.mxu2 %v76_v15  ;;  %99 = vmatpush.msra.mxu0 %v76_v15 }
  0x22   :  { %204 = vmatpush.msra.mxu3 %v122_v20  ;;  %143 = vmatpush.msra.mxu1 %v122_v20 }
  0x23   :  { %190 = vmatpush.msra.mxu2 %v75_v17  ;;  %100 = vmatpush.msra.mxu0 %v75_v17 }
  0x24   :  { %205 = vmatpush.msra.mxu3 %v121_v22  ;;  %144 = vmatpush.msra.mxu1 %v121_v22 }
  0x25   :  { %191 = vmatpush.msra.mxu2 %v74_v19  ;;  %101 = vmatpush.msra.mxu0 %v74_v19 }
  0x26   :  { %206 = vmatpush.msra.mxu3 %v120_v24  ;;  %145 = vmatpush.msra.mxu1 %v120_v24 }
  0x27   :  { %192 = vmatpush.msra.mxu2 %v73_v21  ;;  %102 = vmatpush.msra.mxu0 %v73_v21 }
  0x28   :  { %207 = vmatpush.msra.mxu3 %v119_v26  ;;  %146 = vmatpush.msra.mxu1 %v119_v26 }
  0x29   :  { %193 = vmatpush.msra.mxu2 %v72_v23  ;;  %103 = vmatpush.msra.mxu0 %v72_v23 }
  0x2a   :  { %208 = vmatpush.msra.mxu3 %v118_v30  ;;  %147 = vmatpush.msra.mxu1 %v118_v30 }
  0x2b   :  { %194 = vmatpush.msra.mxu2 %v71_v25  ;;  %104 = vmatpush.msra.mxu0 %v71_v25 }
  0x2c   :  { %209 = vmatpush.msra.mxu3 %v117_v31  ;;  %148 = vmatpush.msra.mxu1 %v117_v31 }
  0x2d   :  { %195 = vmatpush.msra.mxu2 %v70_v27  ;;  %105 = vmatpush.msra.mxu0 %v70_v27 }
  0x2e   :  { %109 = vmatmul.f32.vlgmr.msra.gmra.mxu2 %v69_v28  ;;  %106 = vmatmul.f32.vlgmr.msra.gmra.mxu0 %v68_v29 }
  0x2f   :  { %210 = vmatpush.msra.mxu3 %v116_v32  ;;  %149 = vmatpush.msra.mxu1 %v116_v32 }
  0x31   :  { %211 = vmatpush.msra.mxu3 %v115_v33  ;;  %150 = vmatpush.msra.mxu1 %v115_v33 }
  0xab   :  { %v107_v35 = vpop.f32.mrf.mxu0 }
  0xac   :  { %v108_v36 = vadd.f32 %v218_v34, %v107_v35 }
  0xae   :  { %v113_v37 = vmax.f32 %v108_v36, 0.0 }
  0xb0   :  { %151 = vmatmul.f32.vlgmr.msra.gmra.mxu1 %v113_v37 }
  0xb1   :  { %v110_v38 = vpop.f32.mrf.mxu2 }
  0xb2   :  { %v111_v39 = vadd.f32 %v218_v34, %v110_v38 }
  0xb4   :  { %v114_v40 = vmax.f32 %v111_v39, 0.0 }
  0xb6   :  { %154 = vmatmul.f32.vlgmr.msra.gmra.mxu3 %v114_v40 }
 0x12d   :  { %v152_v42 = vpop.f32.mrf.mxu1 }
 0x12e   :  { %v153_v43 = vadd.f32 %v219_v41, %v152_v42 }
 0x130   :  { %158 = vst [vmem:[#allocation8] sm:$0xff] %v153_v43 }
 0x139   :  { %v155_v44 = vpop.f32.mrf.mxu3 }
 0x13a   :  { %v156_v45 = vadd.f32 %v219_v41, %v155_v44 }
 0x13c   :  { %159 = vst [vmem:[#allocation8 + $0x8] sm:$0xff] %v156_v45 }
 0x13d   :  { %172 = dma.vmem_to_hbm [thread:$0]  %s165_s12, 256, %s167_s2, [#allocation4], %s323_s26, %s323_s26, %s324_s27  }
 0x13e   :  { %320 = dma.done.wait [#allocation4], 256  }
 0x13f   :  { %321 = vsyncadd [#allocation4], 4294967040 }
 0x140   :  { %177 = vsyncpa [#allocation3], 1 }
 0x141   :  { %178 = vsyncpa [#allocation6], 1 }
 0x142   :  { %179 = vsyncpa [#allocation4], 1 }

</bundles_post_ra>
